<compile_context>
chip_gen: v7x
topology: tpu7x:2x2x1
jax: 0.10.0
libtpu: 0.0.40
codegen_flags: <defaults>
</compile_context>

<pallas_src>
import functools

import jax
import jax.numpy as jnp
from jax.experimental import pallas as pl
from jax.experimental.pallas import tpu as pltpu


DIMS = [(7, 512), (512, 256), (256, 128), (128, 2)]
K_PAD = 16          # first-layer contraction dim padded 7 -> 16 (bf16-native tile)
OUT_DIM = 2
OUT_PAD = 128       # final layer padded to a lane-dense 128-wide output
DEFAULT_TB = 1024   # batch rows per grid step (multiple of 8)
VMEM_LIMIT_BYTES = 32 * 1024 * 1024  # explicit budget; safe on v5e/v6e/v7x


def _round_up(n, m):
    return ((n + m - 1) // m) * m


def qnetwork_kernel(x_ref,
                    w1_ref, b1_ref,
                    w2_ref, b2_ref,
                    w3_ref, b3_ref,
                    w4_ref, b4_ref,
                    o_ref):
    """Fused 4-layer MLP forward for one (TB, K_PAD) batch tile.

    Weights are bf16 (MXU inputs); accumulation, bias-add and ReLU are f32.
    The last layer is padded to 128 output lanes (columns 2..127 are zero).
    """
    h = x_ref[...].astype(jnp.bfloat16)

    h = jnp.dot(h, w1_ref[...], preferred_element_type=jnp.float32) + b1_ref[...]
    h = jnp.maximum(h, 0.0)

    h = jnp.dot(h.astype(jnp.bfloat16), w2_ref[...],
                preferred_element_type=jnp.float32) + b2_ref[...]
    h = jnp.maximum(h, 0.0)

    h = jnp.dot(h.astype(jnp.bfloat16), w3_ref[...],
                preferred_element_type=jnp.float32) + b3_ref[...]
    h = jnp.maximum(h, 0.0)

    out = jnp.dot(h.astype(jnp.bfloat16), w4_ref[...],
                  preferred_element_type=jnp.float32) + b4_ref[...]
    o_ref[...] = out.astype(o_ref.dtype)


@functools.partial(jax.jit, static_argnames=("tb",))
def qnetwork_forward(x, params, tb=DEFAULT_TB):
    """x: [B, 7] float32.  params: w{i} [in, out] bf16 (w1 padded to [16, 512],
    w4 padded to [128, 128]), b{i} [1, out] f32 (b4 padded to [1, 128]).
    Returns [B, 2] float32 Q-values."""
    B = x.shape[0]

    # Pad feature dim 7 -> K_PAD (matches the zero-padded rows of w1).
    x = jnp.pad(x.astype(jnp.float32), ((0, 0), (0, K_PAD - x.shape[1])))

    # Pad batch only to a multiple of 8 (sublane tile); never round up to TB.
    Bp = _round_up(B, 8)
    if Bp != B:
        x = jnp.pad(x, ((0, Bp - B), (0, 0)))

    # Batch tile: multiple of 8, no larger than the (padded) batch.
    TB = min(_round_up(tb, 8), Bp)
    grid = (pl.cdiv(Bp, TB),)

    const = lambda i: (0, 0)   # weights/biases: same block every step -> resident in VMEM

    in_specs = [
        pl.BlockSpec((TB, K_PAD), lambda i: (i, 0)),               # x tile
        pl.BlockSpec((K_PAD, 512), const),   pl.BlockSpec((1, 512), const),
        pl.BlockSpec((512, 256), const),     pl.BlockSpec((1, 256), const),
        pl.BlockSpec((256, 128), const),     pl.BlockSpec((1, 128), const),
        pl.BlockSpec((128, OUT_PAD), const), pl.BlockSpec((1, OUT_PAD), const),
    ]
    out_spec = pl.BlockSpec((TB, OUT_PAD), lambda i: (i, 0))        # lane-dense output

    out = pl.pallas_call(
        qnetwork_kernel,
        out_shape=jax.ShapeDtypeStruct((Bp, OUT_PAD), jnp.float32),
        grid_spec=pltpu.PrefetchScalarGridSpec(
            num_scalar_prefetch=0,
            grid=grid,
            in_specs=in_specs,
            out_specs=out_spec,
        ),
        compiler_params=pltpu.CompilerParams(
            dimension_semantics=("parallel",),
            vmem_limit_bytes=VMEM_LIMIT_BYTES),
    )(x,
      params["w1"], params["b1"],
      params["w2"], params["b2"],
      params["w3"], params["b3"],
      params["w4"], params["b4"])

    return out[:B, :OUT_DIM]


def init_params(key):
    """PyTorch nn.Linear default init: U(-1/sqrt(fan_in), +1/sqrt(fan_in)).

    Weights stored as [in, out] (transpose of torch's [out, in]); w1 is
    zero-padded along the input dim 7 -> 16, w4/b4 are zero-padded along the
    output dim 2 -> 128.  Weights bf16, biases f32.
    """
    params = {}
    for i, (fan_in, fan_out) in enumerate(DIMS, start=1):
        key, kw, kb = jax.random.split(key, 3)
        bound = 1.0 / jnp.sqrt(float(fan_in))
        w = jax.random.uniform(kw, (fan_in, fan_out), dtype=jnp.float32,
                               minval=-bound, maxval=bound)
        b = jax.random.uniform(kb, (1, fan_out), dtype=jnp.float32,
                               minval=-bound, maxval=bound)
        if i == 1:
            w = jnp.pad(w, ((0, K_PAD - fan_in), (0, 0)))           # 7 -> 16 zero rows
        if i == 4:
            w = jnp.pad(w, ((0, 0), (0, OUT_PAD - fan_out)))        # 2 -> 128 zero cols
            b = jnp.pad(b, ((0, 0), (0, OUT_PAD - fan_out)))
        params[f"w{i}"] = w.astype(jnp.bfloat16)
        params[f"b{i}"] = b
    return params


def reference_forward(x, params):
    """Plain-JAX reference with the same numerics (bf16 matmul inputs, f32 accum)."""
    h = jnp.pad(x.astype(jnp.float32), ((0, 0), (0, K_PAD - x.shape[1])))
    for i in range(1, 5):
        h = jnp.dot(h.astype(jnp.bfloat16), params[f"w{i}"],
                    preferred_element_type=jnp.float32) + params[f"b{i}"]
        if i < 4:
            h = jnp.maximum(h, 0.0)
    return h[:, :OUT_DIM]


if __name__ == "__main__":
    key = jax.random.PRNGKey(0)
    key_params, key_x1, key_x2, key_x3 = jax.random.split(key, 4)

    params = init_params(key_params)

    # Small batch, single grid step (adaptive TB shrinks to the padded batch).
    x1 = jax.random.normal(key_x1, (64, 7), dtype=jnp.float32)
    out1 = jax.block_until_ready(qnetwork_forward(x1, params))
    ref1 = reference_forward(x1, params)
    assert out1.shape == (64, 2), out1.shape
    assert jnp.allclose(out1, ref1, atol=1e-2, rtol=1e-2), (
        float(jnp.max(jnp.abs(out1 - ref1))))

    # Tiny, non-multiple-of-8 batch (padded to one 8-row tile inside the wrapper).
    x2 = jax.random.normal(key_x2, (5, 7), dtype=jnp.float32)
    out2 = jax.block_until_ready(qnetwork_forward(x2, params))
    ref2 = reference_forward(x2, params)
    assert out2.shape == (5, 2), out2.shape
    assert jnp.allclose(out2, ref2, atol=1e-2, rtol=1e-2), (
        float(jnp.max(jnp.abs(out2 - ref2))))

    # Multi-step grid with a ragged last block: B=40, TB=16 -> 3 steps (16,16,8).
    x3 = jax.random.normal(key_x3, (40, 7), dtype=jnp.float32)
    out3 = jax.block_until_ready(qnetwork_forward(x3, params, tb=16))
    ref3 = reference_forward(x3, params)
    assert out3.shape == (40, 2), out3.shape
    assert jnp.allclose(out3, ref3, atol=1e-2, rtol=1e-2), (
        float(jnp.max(jnp.abs(out3 - ref3))))

    print("KERNEL_OK")
</pallas_src>

<mosaic_0001>
module attributes {stable_mosaic.version = 11 : i64} {
  func.func @qnetwork_kernel(%arg0: i32, %arg1: memref<64x16xf32, #tpu.memory_space<vmem>>, %arg2: memref<16x512xbf16, #tpu.memory_space<vmem>>, %arg3: memref<1x512xf32, #tpu.memory_space<vmem>>, %arg4: memref<512x256xbf16, #tpu.memory_space<vmem>>, %arg5: memref<1x256xf32, #tpu.memory_space<vmem>>, %arg6: memref<256x128xbf16, #tpu.memory_space<vmem>>, %arg7: memref<1x128xf32, #tpu.memory_space<vmem>>, %arg8: memref<128x128xbf16, #tpu.memory_space<vmem>>, %arg9: memref<1x128xf32, #tpu.memory_space<vmem>>, %arg10: memref<64x128xf32, #tpu.memory_space<vmem>>) attributes {dimension_semantics = [#tpu.dimension_semantics<parallel>], iteration_bounds = array<i64: 1>, scalar_prefetch = 0 : i64, scratch_operands = 0 : i64, tpu.core_type = #tpu.core_type<tc>, window_params = [{transform_indices = @transform_0, window_bounds = array<i64: 64, 16>}, {pipeline_mode = #tpu.pipeline_mode<synchronous>, transform_indices = @transform_1, window_bounds = array<i64: 16, 512>}, {pipeline_mode = #tpu.pipeline_mode<synchronous>, transform_indices = @transform_2, window_bounds = array<i64: 1, 512>}, {pipeline_mode = #tpu.pipeline_mode<synchronous>, transform_indices = @transform_3, window_bounds = array<i64: 512, 256>}, {pipeline_mode = #tpu.pipeline_mode<synchronous>, transform_indices = @transform_4, window_bounds = array<i64: 1, 256>}, {pipeline_mode = #tpu.pipeline_mode<synchronous>, transform_indices = @transform_5, window_bounds = array<i64: 256, 128>}, {pipeline_mode = #tpu.pipeline_mode<synchronous>, transform_indices = @transform_6, window_bounds = array<i64: 1, 128>}, {pipeline_mode = #tpu.pipeline_mode<synchronous>, transform_indices = @transform_7, window_bounds = array<i64: 128, 128>}, {pipeline_mode = #tpu.pipeline_mode<synchronous>, transform_indices = @transform_8, window_bounds = array<i64: 1, 128>}, {transform_indices = @transform_9, window_bounds = array<i64: 64, 128>}]} {
    %c0 = arith.constant 0 : index
    %c0_0 = arith.constant 0 : index
    %0 = vector.load %arg1[%c0, %c0_0] : memref<64x16xf32, #tpu.memory_space<vmem>>, vector<64x16xf32>
    %1 = arith.truncf %0 : vector<64x16xf32> to vector<64x16xbf16>
    %c0_1 = arith.constant 0 : index
    %c0_2 = arith.constant 0 : index
    %2 = vector.load %arg2[%c0_1, %c0_2] : memref<16x512xbf16, #tpu.memory_space<vmem>>, vector<16x512xbf16>
    %cst = arith.constant dense<0.000000e+00> : vector<64x512xf32>
    %3 = tpu.matmul %1, %2, %cst {dimension_numbers = #tpu.dot_dimension_numbers<[1], [0], [0], [1], [0, 0, 1, 1], [], []>} : vector<64x16xbf16>, vector<16x512xbf16>, vector<64x512xf32> -> vector<64x512xf32>
    %c0_3 = arith.constant 0 : index
    %c0_4 = arith.constant 0 : index
    %4 = vector.load %arg3[%c0_3, %c0_4] : memref<1x512xf32, #tpu.memory_space<vmem>>, vector<1x512xf32>
    %5 = vector.broadcast %4 : vector<1x512xf32> to vector<64x512xf32>
    %6 = arith.addf %3, %5 : vector<64x512xf32>
    %cst_5 = arith.constant 0.000000e+00 : f32
    %7 = vector.broadcast %cst_5 : f32 to vector<64x512xf32>
    %8 = arith.maximumf %6, %7 : vector<64x512xf32>
    %9 = arith.truncf %8 : vector<64x512xf32> to vector<64x512xbf16>
    %c0_6 = arith.constant 0 : index
    %c0_7 = arith.constant 0 : index
    %10 = vector.load %arg4[%c0_6, %c0_7] : memref<512x256xbf16, #tpu.memory_space<vmem>>, vector<512x256xbf16>
    %cst_8 = arith.constant dense<0.000000e+00> : vector<64x256xf32>
    %11 = tpu.matmul %9, %10, %cst_8 {dimension_numbers = #tpu.dot_dimension_numbers<[1], [0], [0], [1], [0, 0, 1, 1], [], []>} : vector<64x512xbf16>, vector<512x256xbf16>, vector<64x256xf32> -> vector<64x256xf32>
    %c0_9 = arith.constant 0 : index
    %c0_10 = arith.constant 0 : index
    %12 = vector.load %arg5[%c0_9, %c0_10] : memref<1x256xf32, #tpu.memory_space<vmem>>, vector<1x256xf32>
    %13 = vector.broadcast %12 : vector<1x256xf32> to vector<64x256xf32>
    %14 = arith.addf %11, %13 : vector<64x256xf32>
    %cst_11 = arith.constant 0.000000e+00 : f32
    %15 = vector.broadcast %cst_11 : f32 to vector<64x256xf32>
    %16 = arith.maximumf %14, %15 : vector<64x256xf32>
    %17 = arith.truncf %16 : vector<64x256xf32> to vector<64x256xbf16>
    %c0_12 = arith.constant 0 : index
    %c0_13 = arith.constant 0 : index
    %18 = vector.load %arg6[%c0_12, %c0_13] : memref<256x128xbf16, #tpu.memory_space<vmem>>, vector<256x128xbf16>
    %cst_14 = arith.constant dense<0.000000e+00> : vector<64x128xf32>
    %19 = tpu.matmul %17, %18, %cst_14 {dimension_numbers = #tpu.dot_dimension_numbers<[1], [0], [0], [1], [0, 0, 1, 1], [], []>} : vector<64x256xbf16>, vector<256x128xbf16>, vector<64x128xf32> -> vector<64x128xf32>
    %c0_15 = arith.constant 0 : index
    %c0_16 = arith.constant 0 : index
    %20 = vector.load %arg7[%c0_15, %c0_16] : memref<1x128xf32, #tpu.memory_space<vmem>>, vector<1x128xf32>
    %21 = vector.broadcast %20 : vector<1x128xf32> to vector<64x128xf32>
    %22 = arith.addf %19, %21 : vector<64x128xf32>
    %cst_17 = arith.constant 0.000000e+00 : f32
    %23 = vector.broadcast %cst_17 : f32 to vector<64x128xf32>
    %24 = arith.maximumf %22, %23 : vector<64x128xf32>
    %25 = arith.truncf %24 : vector<64x128xf32> to vector<64x128xbf16>
    %c0_18 = arith.constant 0 : index
    %c0_19 = arith.constant 0 : index
    %26 = vector.load %arg8[%c0_18, %c0_19] : memref<128x128xbf16, #tpu.memory_space<vmem>>, vector<128x128xbf16>
    %cst_20 = arith.constant dense<0.000000e+00> : vector<64x128xf32>
    %27 = tpu.matmul %25, %26, %cst_20 {dimension_numbers = #tpu.dot_dimension_numbers<[1], [0], [0], [1], [0, 0, 1, 1], [], []>} : vector<64x128xbf16>, vector<128x128xbf16>, vector<64x128xf32> -> vector<64x128xf32>
    %c0_21 = arith.constant 0 : index
    %c0_22 = arith.constant 0 : index
    %28 = vector.load %arg9[%c0_21, %c0_22] : memref<1x128xf32, #tpu.memory_space<vmem>>, vector<1x128xf32>
    %29 = vector.broadcast %28 : vector<1x128xf32> to vector<64x128xf32>
    %30 = arith.addf %27, %29 : vector<64x128xf32>
    %c0_23 = arith.constant 0 : index
    %c0_24 = arith.constant 0 : index
    %31 = vector.load %arg10[%c0_23, %c0_24] : memref<64x128xf32, #tpu.memory_space<vmem>>, vector<64x128xf32>
    tpu.vector_store %arg10[%c0_23, %c0_24], %30 {strides = array<i32>} : memref<64x128xf32, #tpu.memory_space<vmem>>, vector<64x128xf32>,
    return
  }
  func.func @transform_0(%arg0: i32) -> (i32, i32) {
    %c0_i32 = arith.constant 0 : i32
    %c0_i32_0 = arith.constant 0 : i32
    return %arg0, %c0_i32 : i32, i32
  }
  func.func @transform_1(%arg0: i32) -> (i32, i32) {
    %c0_i32 = arith.constant 0 : i32
    %c0_i32_0 = arith.constant 0 : i32
    %c0_i32_1 = arith.constant 0 : i32
    return %c0_i32, %c0_i32_0 : i32, i32
  }
  func.func @transform_2(%arg0: i32) -> (i32, i32) {
    %c0_i32 = arith.constant 0 : i32
    %c0_i32_0 = arith.constant 0 : i32
    %c0_i32_1 = arith.constant 0 : i32
    return %c0_i32, %c0_i32_0 : i32, i32
  }
  func.func @transform_3(%arg0: i32) -> (i32, i32) {
    %c0_i32 = arith.constant 0 : i32
    %c0_i32_0 = arith.constant 0 : i32
    %c0_i32_1 = arith.constant 0 : i32
    return %c0_i32, %c0_i32_0 : i32, i32
  }
  func.func @transform_4(%arg0: i32) -> (i32, i32) {
    %c0_i32 = arith.constant 0 : i32
    %c0_i32_0 = arith.constant 0 : i32
    %c0_i32_1 = arith.constant 0 : i32
    return %c0_i32, %c0_i32_0 : i32, i32
  }
  func.func @transform_5(%arg0: i32) -> (i32, i32) {
    %c0_i32 = arith.constant 0 : i32
    %c0_i32_0 = arith.constant 0 : i32
    %c0_i32_1 = arith.constant 0 : i32
    return %c0_i32, %c0_i32_0 : i32, i32
  }
  func.func @transform_6(%arg0: i32) -> (i32, i32) {
    %c0_i32 = arith.constant 0 : i32
    %c0_i32_0 = arith.constant 0 : i32
    %c0_i32_1 = arith.constant 0 : i32
    return %c0_i32, %c0_i32_0 : i32, i32
  }
  func.func @transform_7(%arg0: i32) -> (i32, i32) {
    %c0_i32 = arith.constant 0 : i32
    %c0_i32_0 = arith.constant 0 : i32
    %c0_i32_1 = arith.constant 0 : i32
    return %c0_i32, %c0_i32_0 : i32, i32
  }
  func.func @transform_8(%arg0: i32) -> (i32, i32) {
    %c0_i32 = arith.constant 0 : i32
    %c0_i32_0 = arith.constant 0 : i32
    %c0_i32_1 = arith.constant 0 : i32
    return %c0_i32, %c0_i32_0 : i32, i32
  }
  func.func @transform_9(%arg0: i32) -> (i32, i32) {
    %c0_i32 = arith.constant 0 : i32
    %c0_i32_0 = arith.constant 0 : i32
    return %arg0, %c0_i32 : i32, i32
  }
}

</mosaic_0001>

<bundles_post_ra>
// kernel: qnetwork_forward.1
= control target key start
LH: loop header
LB: loop body
LE: loop exit
PB: predicated region body
PF: predicated region fallthrough
CT: control target
= control target key end

     0   :  { %14 = vsyncpa [#allocation3], 0  ;;  %s1995_s0 = inlined_call_operand.vmem [shape: f32[64,16], index: 0, kind: input, shape index: {}]   ;;  %s1996_s1 = inlined_call_operand.vmem [shape: bf16[16,512], index: 1, kind: input, shape index: {}]   ;;  %s1997_s2 = inlined_call_operand.hbm [shape: f32[1,512], index: 2, kind: input, shape index: {}]   ;;  %s1998_s3 = inlined_call_operand.hbm [shape: bf16[512,256], index: 3, kind: input, shape index: {}]   ;;  %s1999_s4 = inlined_call_operand.vmem [shape: f32[1,256], index: 4, kind: input, shape index: {}]   ;;  %s2000_s5 = inlined_call_operand.vmem [shape: bf16[256,128], index: 5, kind: input, shape index: {}]   ;;  %s2001_s6 = inlined_call_operand.vmem [shape: f32[1,128], index: 6, kind: input, shape index: {}]   ;;  %s2002_s7 = inlined_call_operand.vmem [shape: bf16[128,128], index: 7, kind: input, shape index: {}]   ;;  %s2003_s8 = inlined_call_operand.hbm [shape: f32[1,128], index: 8, kind: input, shape index: {}]   ;;  %s2004_s9 = inlined_call_operand.vmem [shape: f32[64,128], index: 9, kind: output, shape index: {}]  }
   0x1   :  { %15 = vsyncpa [#allocation5], 0  ;;  %s1675_s30 = smov [#allocation4]   ;;  %s1605_s13 = scalar_lea.hbm %s1998_s3, 8192 }
   0x2   :  { %s35_s10 = sshll.u32 %s1675_s30, 4  ;;  %p1606_p0 = scmp.ne.s32.totalorder %s1998_s3, %s1605_s13  ;;  %s36_s10 = int_to_ptr.vmem [resolvable:$true] %s35_s10 }
   0x3   :  { %p1609_p1 = scmp.lt.u32.totalorder %s1605_s13, %s1998_s3 }
   0x5   :  { %p1611_p2 = pnand %p1609_p1, %p1606_p0 }
   0x7   :  { %1614 = shalt.err (!%p1611_p2)
}
   0x8   :  { %s1615_s18 = scalar_lea.vmem %s36_s10, 8192  ;;  %p1620_p4 = scmp.lt.s32.totalorder %s36_s10, %s36_s10 }
   0x9   :  { %p1616_p3 = scmp.ne.s32.totalorder %s36_s10, %s1615_s18  ;;  %p1621_p5 = scmp.lt.s32.totalorder %s1615_s18, %s1615_s18 }
   0xb   :  { %p1622_p6 = por %p1621_p5, %p1620_p4 }
   0xd   :  { %p1623_p7 = pnand %p1622_p6, %p1616_p3 }
   0xf   :  { %1626 = shalt.err (!%p1623_p7)
}
  0x10   :  { %s1676_s19 = smov 128   ;;  %s1677_s20 = smov 8  }
  0x11   :  { %41 = dma.hbm_to_vmem [thread:$0]  %s1998_s3, 8192, %s36_s10, [#allocation5], %s1676_s19, %s1676_s19, %s1677_s20  }
  0x12   :  { %s1678_s23 = smov [#allocation2]   ;;  %s1679_s25 = smov [#allocation6]  }
  0x13   :  { %s26_s24 = sshll.u32 %s1678_s23, 4  ;;  %s56_s26 = sshll.u32 %s1679_s25, 4  ;;  %s27_s24 = int_to_ptr.vmem [resolvable:$true] %s26_s24  ;;  %s57_s26 = int_to_ptr.vmem [resolvable:$true] %s56_s26 }
  0x14   :  { %s1627_s29 = scalar_lea.hbm %s1997_s2, 64 }
  0x15   :  { %p1628_p8 = scmp.ne.s32.totalorder %s1997_s2, %s1627_s29  ;;  %p1631_p9 = scmp.lt.u32.totalorder %s1627_s29, %s1997_s2 }
  0x17   :  { %p1633_p10 = pnand %p1631_p9, %p1628_p8 }
  0x19   :  { %1636 = shalt.err (!%p1633_p10)
}
  0x1a   :  { %s1637_s3 = scalar_lea.vmem %s27_s24, 64  ;;  %p1642_p12 = scmp.lt.s32.totalorder %s27_s24, %s27_s24 }
  0x1b   :  { %p1638_p11 = scmp.ne.s32.totalorder %s27_s24, %s1637_s3  ;;  %p1643_p13 = scmp.lt.s32.totalorder %s1637_s3, %s1637_s3 }
  0x1d   :  { %p1644_p0 = por %p1643_p13, %p1642_p12 }
  0x1f   :  { %p1645_p1 = pnand %p1644_p0, %p1638_p11 }
  0x21   :  { %1648 = shalt.err (!%p1645_p1)
}
  0x22   :  { %29 = dma.hbm_to_vmem [thread:$0]  %s1997_s2, 64, %s27_s24, [#allocation3]  }
  0x23   :  { %s1649_s17 = scalar_lea.hbm %s2003_s8, 16 }
  0x24   :  { %p1650_p2 = scmp.ne.s32.totalorder %s2003_s8, %s1649_s17  ;;  %p1653_p3 = scmp.lt.u32.totalorder %s1649_s17, %s2003_s8 }
  0x26   :  { %p1655_p4 = pnand %p1653_p3, %p1650_p2 }
  0x28   :  { %1658 = shalt.err (!%p1655_p4)
}
  0x29   :  { %s1659_s22 = scalar_lea.vmem %s57_s26, 16  ;;  %s1663_s23 = scalar_lea.vmem %s57_s26, 32 }
  0x2a   :  { %p1660_p5 = scmp.ne.s32.totalorder %s57_s26, %s1659_s22  ;;  %p1664_p6 = scmp.lt.s32.totalorder %s57_s26, %s57_s26 }
  0x2b   :  { %p1665_p7 = scmp.lt.s32.totalorder %s1663_s23, %s1659_s22 }
  0x2d   :  { %p1666_p8 = por %p1665_p7, %p1664_p6 }
  0x2f   :  { %p1667_p9 = pnand %p1666_p8, %p1660_p5 }
  0x31   :  { %1670 = shalt.err (!%p1667_p9)
}
  0x32   :  { %59 = dma.hbm_to_vmem [thread:$0]  %s2003_s8, 16, %s57_s26, [#allocation5]  }
  0x33   :  { %1671 = dma.done.wait [#allocation3], 64  }
  0x34   :  { %1672 = vsyncadd [#allocation3], 4294967232 }
  0x35   :  { %1673 = dma.done.wait [#allocation5], 8208  }
  0x36   :  { %1674 = vsyncadd [#allocation5], 4294959088  ;;  %v1680_v0 = vmov 0   ;;  %v1479_v1 = vld [vmem:[%s1996_s1 + $0x4] ss:$16 sps:$4 sm:$0xff]   ;;  %v71_v6 = vld [vmem:[%s1995_s0 + $0x8] sm:$0xff] }
  0x37   :  { %173 = vmatprep.mubr.bf16.mxu0 %v1680_v0  ;;  %246 = vmatprep.mubr.bf16.mxu1 %v1680_v0  ;;  %v1481_v2 = vld [vmem:[%s1996_s1 + $0xc] ss:$16 sps:$4 sm:$0xff]   ;;  %v1483_v3 = vld [vmem:[%s1996_s1] ss:$16 sps:$4 sm:$0xff]   ;;  %v1484_v4 = vld [vmem:[%s1996_s1 + $0x8] ss:$16 sps:$4 sm:$0xff]  }
  0x38   :  { %141 = vmatprep.subr.bf16.mxu0 %v1479_v1  ;;  %v70_v5 = vld [vmem:[%s1995_s0] sm:$0xff]  ;;  %214 = vmatprep.subr.bf16.mxu1 %v1481_v2  ;;  %vm128_vm0 = vcmask 130048   ;;  %v72_v8 = vld [vmem:[%s1995_s0 + $0x10] sm:$0xff]  ;;  %v73_v9 = vld [vmem:[%s1995_s0 + $0x18] sm:$0xff] }
  0x39   :  { %142 = vmatpush1.bf16.msra.mxu0 %v1483_v3  ;;  %215 = vmatpush1.bf16.msra.mxu1 %v1484_v4  ;;  %v78_v7 = vpack.c.bf16 %v71_v6, %v70_v5  ;;  %v1485_v10 = vld [vmem:[#allocation4] ss:$8 sps:$4 sm:$0xff]   ;;  %v1487_v11 = vld [vmem:[#allocation4 + $0x4] ss:$8 sps:$4 sm:$0xff]   ;;  %v1491_v14 = vld [vmem:[#allocation4 + $0x10] ss:$8 sps:$4 sm:$0xff]   ;;  %v79_v18 = vpack.c.bf16 %v73_v9, %v72_v8 }
  0x3a   :  { %v1488_v12 = vld [vmem:[#allocation4 + $0x100] ss:$8 sps:$4 sm:$0xff]   ;;  %v1490_v13 = vld [vmem:[#allocation4 + $0x104] ss:$8 sps:$4 sm:$0xff]   ;;  %731 = vmatprep.subr.bf16.mxu1 %v1487_v11  ;;  %v1493_v15 = vld [vmem:[#allocation4 + $0x14] ss:$8 sps:$4 sm:$0xff]  }
  0x3b   :  { %804 = vmatprep.subr.bf16.mxu0 %v1490_v13  ;;  %v1494_v16 = vld [vmem:[#allocation4 + $0x110] ss:$8 sps:$4 sm:$0xff]   ;;  %v1496_v17 = vld [vmem:[#allocation4 + $0x114] ss:$8 sps:$4 sm:$0xff]   ;;  %v1499_v19 = vld [vmem:[#allocation4 + $0x24] ss:$8 sps:$4 sm:$0xff]  }
  0x3c   :  { %1267 = vmatmul.mubr.msk.bf16.vlgmr.msra.gmra.mrb[0].mxu0 %vm128_vm0, %v78_v7  ;;  %1271 = vmatmul.mubr.msk.bf16.vlgmr.msra.gmra.mrb[0].mxu1 %vm128_vm0, %v78_v7  ;;  %v1502_v20 = vld [vmem:[#allocation4 + $0x124] ss:$8 sps:$4 sm:$0xff]   ;;  %v74_v21 = vld [vmem:[%s1995_s0 + $0x20] sm:$0xff]  ;;  %v1503_v27 = vld [vmem:[#allocation4 + $0x30] ss:$8 sps:$4 sm:$0xff]  }
  0x3d   :  { %183 = vmatprep.mubr.bf16.mxu0 %v1680_v0  ;;  %256 = vmatprep.mubr.bf16.mxu1 %v1680_v0  ;;  %v1497_v22 = vld [vmem:[#allocation4 + $0x20] ss:$8 sps:$4 sm:$0xff]   ;;  %v1505_v24 = vld [vmem:[#allocation4 + $0x34] ss:$8 sps:$4 sm:$0xff]   ;;  %v1506_v28 = vld [vmem:[#allocation4 + $0x130] ss:$8 sps:$4 sm:$0xff]  }
  0x3e   :  { %732 = vmatpush1.bf16.msra.mxu1 %v1485_v10  ;;  %805 = vmatpush1.bf16.msra.mxu0 %v1488_v12  ;;  %v1500_v23 = vld [vmem:[#allocation4 + $0x120] ss:$8 sps:$4 sm:$0xff]   ;;  %v1508_v25 = vld [vmem:[#allocation4 + $0x134] ss:$8 sps:$4 sm:$0xff]   ;;  %v1511_v30 = vld [vmem:[#allocation4 + $0x44] ss:$8 sps:$4 sm:$0xff]  }
  0x3f   :  { %733 = vmatprep.subr.bf16.mxu1 %v1493_v15  ;;  %806 = vmatprep.subr.bf16.mxu0 %v1496_v17  ;;  %v75_v26 = vld [vmem:[%s1995_s0 + $0x28] sm:$0xff]  ;;  %v76_v32 = vld [vmem:[%s1995_s0 + $0x30] sm:$0xff]  ;;  %v1517_v35 = vld [vmem:[#allocation4 + $0x54] ss:$8 sps:$4 sm:$0xff]  }
  0x40   :  { %v80_v29 = vpack.c.bf16 %v75_v26, %v74_v21  ;;  %v1514_v31 = vld [vmem:[#allocation4 + $0x144] ss:$8 sps:$4 sm:$0xff]   ;;  %v1509_v33 = vld [vmem:[#allocation4 + $0x40] ss:$8 sps:$4 sm:$0xff]   ;;  %v1520_v36 = vld [vmem:[#allocation4 + $0x154] ss:$8 sps:$4 sm:$0xff]  }
  0x41   :  { %v1512_v34 = vld [vmem:[#allocation4 + $0x140] ss:$8 sps:$4 sm:$0xff]   ;;  %v77_v37 = vld [vmem:[%s1995_s0 + $0x38] sm:$0xff]  ;;  %v1523_v41 = vld [vmem:[#allocation4 + $0x64] ss:$8 sps:$4 sm:$0xff]  }
  0x42   :  { %734 = vmatpush1.bf16.msra.mxu1 %v1491_v14  ;;  %807 = vmatpush1.bf16.msra.mxu0 %v1494_v16  ;;  %v1515_v38 = vld [vmem:[#allocation4 + $0x50] ss:$8 sps:$4 sm:$0xff]   ;;  %v81_v40 = vpack.c.bf16 %v77_v37, %v76_v32  ;;  %v1526_v42 = vld [vmem:[#allocation4 + $0x164] ss:$8 sps:$4 sm:$0xff]   ;;  %v1521_v43 = vld [vmem:[#allocation4 + $0x60] ss:$8 sps:$4 sm:$0xff]  }
  0x43   :  { %735 = vmatprep.subr.bf16.mxu1 %v1499_v19  ;;  %808 = vmatprep.subr.bf16.mxu0 %v1502_v20  ;;  %v1518_v39 = vld [vmem:[#allocation4 + $0x150] ss:$8 sps:$4 sm:$0xff]   ;;  %v1524_v44 = vld [vmem:[#allocation4 + $0x160] ss:$8 sps:$4 sm:$0xff]   ;;  %v1529_v45 = vld [vmem:[#allocation4 + $0x74] ss:$8 sps:$4 sm:$0xff]  }
  0x44   :  { %1268 = vmatmul.mubr.msk.bf16.gmra.mrb[4].mxu0 %vm128_vm0, %v79_v18  ;;  %1272 = vmatmul.mubr.msk.bf16.gmra.mrb[4].mxu1 %vm128_vm0, %v79_v18  ;;  %v1532_v46 = vld [vmem:[#allocation4 + $0x174] ss:$8 sps:$4 sm:$0xff]   ;;  %v1527_v47 = vld [vmem:[#allocation4 + $0x70] ss:$8 sps:$4 sm:$0xff]   ;;  %v1535_v49 = vld [vmem:[#allocation4 + $0x84] ss:$8 sps:$4 sm:$0xff]   ;;  %v88_v18 = vlaneseq }
  0x45   :  { %193 = vmatprep.mubr.bf16.mxu0 %v1680_v0  ;;  %266 = vmatprep.mubr.bf16.mxu1 %v1680_v0  ;;  %v1530_v48 = vld [vmem:[#allocation4 + $0x170] ss:$8 sps:$4 sm:$0xff]   ;;  %v1538_v50 = vld [vmem:[#allocation4 + $0x184] ss:$8 sps:$4 sm:$0xff]   ;;  %v1533_v51 = vld [vmem:[#allocation4 + $0x80] ss:$8 sps:$4 sm:$0xff]  }
  0x46   :  { %736 = vmatpush1.bf16.msra.mxu1 %v1497_v22  ;;  %809 = vmatpush1.bf16.msra.mxu0 %v1500_v23  ;;  %v1536_v52 = vld [vmem:[#allocation4 + $0x180] ss:$8 sps:$4 sm:$0xff]   ;;  %v1541_v53 = vld [vmem:[#allocation4 + $0x94] ss:$8 sps:$4 sm:$0xff]   ;;  %v1539_v55 = vld [vmem:[#allocation4 + $0x90] ss:$8 sps:$4 sm:$0xff]  }
  0x47   :  { %737 = vmatprep.subr.bf16.mxu1 %v1505_v24  ;;  %810 = vmatprep.subr.bf16.mxu0 %v1508_v25  ;;  %v1544_v54 = vld [vmem:[#allocation4 + $0x194] ss:$8 sps:$4 sm:$0xff]   ;;  %v1542_v56 = vld [vmem:[#allocation4 + $0x190] ss:$8 sps:$4 sm:$0xff]   ;;  %v1547_v57 = vld [vmem:[#allocation4 + $0xa4] ss:$8 sps:$4 sm:$0xff]  }
  0x48   :  { %v1550_v58 = vld [vmem:[#allocation4 + $0x1a4] ss:$8 sps:$4 sm:$0xff]   ;;  %v1545_v59 = vld [vmem:[#allocation4 + $0xa0] ss:$8 sps:$4 sm:$0xff]   ;;  %v1553_v61 = vld [vmem:[#allocation4 + $0xb4] ss:$8 sps:$4 sm:$0xff]  }
  0x49   :  { %v1548_v60 = vld [vmem:[#allocation4 + $0x1a0] ss:$8 sps:$4 sm:$0xff]   ;;  %v1556_v62 = vld [vmem:[#allocation4 + $0x1b4] ss:$8 sps:$4 sm:$0xff]   ;;  %v1551_v63 = vld [vmem:[#allocation4 + $0xb0] ss:$8 sps:$4 sm:$0xff]  }
  0x4a   :  { %738 = vmatpush1.bf16.msra.mxu1 %v1503_v27  ;;  %811 = vmatpush1.bf16.msra.mxu0 %v1506_v28  ;;  %v1559_v1 = vld [vmem:[#allocation4 + $0xc4] ss:$8 sps:$4 sm:$0xff]   ;;  %v1557_v3 = vld [vmem:[#allocation4 + $0xc0] ss:$8 sps:$4 sm:$0xff]   ;;  %v1565_v5 = vld [vmem:[#allocation4 + $0xd4] ss:$8 sps:$4 sm:$0xff]  }
  0x4b   :  { %739 = vmatprep.subr.bf16.mxu1 %v1511_v30  ;;  %812 = vmatprep.subr.bf16.mxu0 %v1514_v31  ;;  %v1562_v2 = vld [vmem:[#allocation4 + $0x1c4] ss:$8 sps:$4 sm:$0xff]   ;;  %v1560_v4 = vld [vmem:[#allocation4 + $0x1c0] ss:$8 sps:$4 sm:$0xff]   ;;  %v1568_v6 = vld [vmem:[#allocation4 + $0x1d4] ss:$8 sps:$4 sm:$0xff]  }
  0x4c   :  { %1269 = vmatmul.mubr.msk.bf16.gmra.mrb[8].mxu0 %vm128_vm0, %v80_v29  ;;  %1273 = vmatmul.mubr.msk.bf16.gmra.mrb[8].mxu1 %vm128_vm0, %v80_v29  ;;  %v1563_v7 = vld [vmem:[#allocation4 + $0xd0] ss:$8 sps:$4 sm:$0xff]   ;;  %v1571_v9 = vld [vmem:[#allocation4 + $0xe4] ss:$8 sps:$4 sm:$0xff]   ;;  %v1569_v11 = vld [vmem:[#allocation4 + $0xe0] ss:$8 sps:$4 sm:$0xff]  }
  0x4d   :  { %203 = vmatprep.mubr.bf16.mxu0 %v1680_v0  ;;  %276 = vmatprep.mubr.bf16.mxu1 %v1680_v0  ;;  %v1554_v0 = vld [vmem:[#allocation4 + $0x1b0] ss:$8 sps:$4 sm:$0xff]   ;;  %v1574_v10 = vld [vmem:[#allocation4 + $0x1e4] ss:$8 sps:$4 sm:$0xff]   ;;  %v1572_v12 = vld [vmem:[#allocation4 + $0x1e0] ss:$8 sps:$4 sm:$0xff]  }
  0x4e   :  { %740 = vmatpush1.bf16.msra.mxu1 %v1509_v33  ;;  %813 = vmatpush1.bf16.msra.mxu0 %v1512_v34  ;;  %v1566_v8 = vld [vmem:[#allocation4 + $0x1d0] ss:$8 sps:$4 sm:$0xff]   ;;  %v1577_v13 = vld [vmem:[#allocation4 + $0xf4] ss:$8 sps:$4 sm:$0xff]   ;;  %v1822_v19 = vshrl.u32 %v88_v18, 7 }
  0x4f   :  { %741 = vmatprep.subr.bf16.mxu1 %v1517_v35  ;;  %814 = vmatprep.subr.bf16.mxu0 %v1520_v36  ;;  %v1580_v14 = vld [vmem:[#allocation4 + $0x1f4] ss:$8 sps:$4 sm:$0xff]   ;;  %v1575_v15 = vld [vmem:[#allocation4 + $0xf0] ss:$8 sps:$4 sm:$0xff]  }
  0x50   :  { %v1578_v16 = vld [vmem:[#allocation4 + $0x1f0] ss:$8 sps:$4 sm:$0xff]   ;;  %v1581_v17 = vld [vmem:[%s2000_s5 + $0x40] sm:$0xff]   ;;  %v90_v20 = vsub.s32 0, %v1822_v19  ;;  %v98_v21 = vsub.s32 2, %v1822_v19  ;;  %v94_v23 = vsub.s32 1, %v1822_v19 }
  0x51   :  { %v86_v22 = vld [vmem:[#allocation2] sm:$0xf]  ;;  %v102_v24 = vsub.s32 3, %v1822_v19 }
  0x52   :  { %742 = vmatpush1.bf16.msra.mxu1 %v1515_v38  ;;  %815 = vmatpush1.bf16.msra.mxu0 %v1518_v39  ;;  %v1830_v25 = vrot.slane %v86_v22, %v90_v20  ;;  %v1832_v26 = vrot.slane %v86_v22, %v98_v21  ;;  %v1836_v27 = vrot.slane %v86_v22, %v94_v23 }
  0x53   :  { %743 = vmatprep.subr.bf16.mxu1 %v1523_v41  ;;  %816 = vmatprep.subr.bf16.mxu0 %v1526_v42  ;;  %v1838_v28 = vrot.slane %v86_v22, %v102_v24 }
  0x54   :  { %1270 = vmatmul.mubr.msk.bf16.gmra.mrb[12].mxu0 %vm128_vm0, %v81_v40  ;;  %1274 = vmatmul.mubr.msk.bf16.gmra.mrb[12].mxu1 %vm128_vm0, %v81_v40 }
  0x56   :  { %744 = vmatpush1.bf16.msra.mxu1 %v1521_v43  ;;  %817 = vmatpush1.bf16.msra.mxu0 %v1524_v44 }
  0x57   :  { %745 = vmatprep.subr.bf16.mxu1 %v1529_v45  ;;  %818 = vmatprep.subr.bf16.mxu0 %v1532_v46 }
  0x5a   :  { %746 = vmatpush1.bf16.msra.mxu1 %v1527_v47  ;;  %819 = vmatpush1.bf16.msra.mxu0 %v1530_v48 }
  0x5b   :  { %747 = vmatprep.subr.bf16.mxu1 %v1535_v49  ;;  %820 = vmatprep.subr.bf16.mxu0 %v1538_v50 }
  0x5e   :  { %748 = vmatpush1.bf16.msra.mxu1 %v1533_v51  ;;  %821 = vmatpush1.bf16.msra.mxu0 %v1536_v52 }
  0x5f   :  { %749 = vmatprep.subr.bf16.mxu1 %v1541_v53  ;;  %822 = vmatprep.subr.bf16.mxu0 %v1544_v54 }
  0x62   :  { %750 = vmatpush1.bf16.msra.mxu1 %v1539_v55  ;;  %823 = vmatpush1.bf16.msra.mxu0 %v1542_v56 }
  0x63   :  { %751 = vmatprep.subr.bf16.mxu1 %v1547_v57  ;;  %824 = vmatprep.subr.bf16.mxu0 %v1550_v58 }
  0x66   :  { %752 = vmatpush1.bf16.msra.mxu1 %v1545_v59  ;;  %825 = vmatpush1.bf16.msra.mxu0 %v1548_v60  ;;  %v1582_v59 = vld [vmem:[%s2000_s5] sm:$0xff]  }
  0x67   :  { %753 = vmatprep.subr.bf16.mxu1 %v1553_v61  ;;  %826 = vmatprep.subr.bf16.mxu0 %v1556_v62 }
  0x6a   :  { %754 = vmatpush1.bf16.msra.mxu1 %v1551_v63  ;;  %827 = vmatpush1.bf16.msra.mxu0 %v1554_v0  ;;  %v1583_v0 = vld [vmem:[%s2000_s5 + $0x48] sm:$0xff]  }
  0x6b   :  { %755 = vmatprep.subr.bf16.mxu1 %v1559_v1  ;;  %828 = vmatprep.subr.bf16.mxu0 %v1562_v2 }
  0x6e   :  { %756 = vmatpush1.bf16.msra.mxu1 %v1557_v3  ;;  %829 = vmatpush1.bf16.msra.mxu0 %v1560_v4 }
  0x6f   :  { %757 = vmatprep.subr.bf16.mxu1 %v1565_v5  ;;  %830 = vmatprep.subr.bf16.mxu0 %v1568_v6 }
  0x72   :  { %758 = vmatpush1.bf16.msra.mxu1 %v1563_v7  ;;  %831 = vmatpush1.bf16.msra.mxu0 %v1566_v8 }
  0x73   :  { %759 = vmatprep.subr.bf16.mxu1 %v1571_v9  ;;  %832 = vmatprep.subr.bf16.mxu0 %v1574_v10 }
  0x76   :  { %760 = vmatpush1.bf16.msra.mxu1 %v1569_v11  ;;  %833 = vmatpush1.bf16.msra.mxu0 %v1572_v12 }
  0x77   :  { %761 = vmatprep.subr.bf16.mxu1 %v1577_v13  ;;  %834 = vmatprep.subr.bf16.mxu0 %v1580_v14  ;;  %v1584_v13 = vld [vmem:[%s2000_s5 + $0x8] sm:$0xff]  }
  0x7a   :  { %762 = vmatpush1.bf16.msra.mxu1 %v1575_v15  ;;  %835 = vmatpush1.bf16.msra.mxu0 %v1578_v16 }
  0x7b   :  { %1365 = vmatprep.subr.bf16.mxu0 %v1581_v17  ;;  %v1585_v17 = vld [vmem:[%s2000_s5 + $0x50] sm:$0xff]  }
 0x10f   :  { %v175_v29 = vpop.f32.mrb[0].mxu0  ;;  %v248_v30 = vpop.f32.mrb[0].mxu1 }
 0x110   :  { %v176_v31 = vadd.f32 %v175_v29, %v1830_v25  ;;  %v249_v32 = vadd.f32 %v248_v30, %v1832_v26  ;;  %v177_v33 = vpop.f32.mrb[1].mxu0  ;;  %v250_v34 = vpop.f32.mrb[1].mxu1 }
 0x111   :  { %v178_v35 = vadd.f32 %v177_v33, %v1836_v27  ;;  %v251_v36 = vadd.f32 %v250_v34, %v1838_v28  ;;  %v179_v37 = vpop.f32.mrb[2].mxu0  ;;  %v252_v38 = vpop.f32.mrb[2].mxu1  ;;  %v1586_v34 = vld [vmem:[%s2000_s5 + $0x10] sm:$0xff]  }
 0x112   :  { %v289_v39 = vmax.f32 %v249_v32, 0.0  ;;  %v180_v40 = vadd.f32 %v179_v37, %v1830_v25  ;;  %v253_v41 = vadd.f32 %v252_v38, %v1832_v26  ;;  %v181_v42 = vpop.f32.mrb[3].mxu0  ;;  %v254_v43 = vpop.f32.mrb[3].mxu1  ;;  %v287_v47 = vmax.f32 %v176_v31, 0.0 }
 0x113   :  { %v290_v44 = vmax.f32 %v251_v36, 0.0  ;;  %v182_v45 = vadd.f32 %v181_v42, %v1836_v27  ;;  %v255_v46 = vadd.f32 %v254_v43, %v1838_v28  ;;  %v288_v50 = vmax.f32 %v178_v35, 0.0 }
 0x114   :  { %v291_v48 = vmax.f32 %v180_v40, 0.0  ;;  %v293_v49 = vmax.f32 %v253_v41, 0.0 }
 0x115   :  { %v292_v51 = vmax.f32 %v182_v45, 0.0  ;;  %v294_v52 = vmax.f32 %v255_v46, 0.0 }
 0x116   :  { %v319_v53 = vpack.c.bf16 %v291_v48, %v287_v47  ;;  %v321_v54 = vpack.c.bf16 %v293_v49, %v289_v39  ;;  %v1587_v39 = vld [vmem:[%s2000_s5 + $0x58] sm:$0xff]  }
 0x117   :  { %v320_v55 = vpack.c.bf16 %v292_v51, %v288_v50  ;;  %v322_v56 = vpack.c.bf16 %v294_v52, %v290_v44  ;;  %v185_v57 = vpop.f32.mrb[4].mxu0  ;;  %v258_v58 = vpop.f32.mrb[4].mxu1  ;;  %v1588_v52 = vld [vmem:[%s2000_s5 + $0x18] sm:$0xff]  }
 0x118   :  { %v186_v60 = vadd.f32 %v185_v57, %v1830_v25  ;;  %v259_v61 = vadd.f32 %v258_v58, %v1832_v26  ;;  %v187_v62 = vpop.f32.mrb[5].mxu0  ;;  %v260_v63 = vpop.f32.mrb[5].mxu1 }
 0x119   :  { %v188_v1 = vadd.f32 %v187_v62, %v1836_v27  ;;  %v261_v2 = vadd.f32 %v260_v63, %v1838_v28  ;;  %v189_v3 = vpop.f32.mrb[6].mxu0  ;;  %v262_v4 = vpop.f32.mrb[6].mxu1  ;;  %763 = vmatprep.mubr.bf16.mxu1 %v320_v55  ;;  %836 = vmatprep.mubr.bf16.mxu0 %v322_v56  ;;  %v1589_v56 = vld [vmem:[%s2000_s5 + $0x60] sm:$0xff]  }
 0x11a   :  { %v297_v5 = vmax.f32 %v259_v61, 0.0  ;;  %v190_v6 = vadd.f32 %v189_v3, %v1830_v25  ;;  %v263_v7 = vadd.f32 %v262_v4, %v1832_v26  ;;  %v191_v8 = vpop.f32.mrb[7].mxu0  ;;  %v264_v9 = vpop.f32.mrb[7].mxu1  ;;  %764 = vmatmul.mubr.bf16.vlgmr.msra.gmra.mrb[16].mxu1 %v319_v53  ;;  %837 = vmatmul.mubr.bf16.vlgmr.msra.gmra.mrb[16].mxu0 %v321_v54  ;;  %v295_v14 = vmax.f32 %v186_v60, 0.0 }
 0x11b   :  { %v298_v10 = vmax.f32 %v261_v2, 0.0  ;;  %v192_v11 = vadd.f32 %v191_v8, %v1836_v27  ;;  %v265_v12 = vadd.f32 %v264_v9, %v1838_v28  ;;  %1366 = vmatpush3.bf16.msra.mxu0 %v1582_v59  ;;  %v296_v18 = vmax.f32 %v188_v1, 0.0  ;;  %v1590_v2 = vld [vmem:[%s2000_s5 + $0x20] sm:$0xff]  }
 0x11c   :  { %v299_v15 = vmax.f32 %v190_v6, 0.0  ;;  %v301_v16 = vmax.f32 %v263_v7, 0.0  ;;  %1367 = vmatprep.subr.bf16.mxu0 %v1583_v0 }
 0x11d   :  { %v300_v21 = vmax.f32 %v192_v11, 0.0  ;;  %v302_v22 = vmax.f32 %v265_v12, 0.0 }
 0x11e   :  { %v323_v24 = vpack.c.bf16 %v299_v15, %v295_v14  ;;  %v325_v29 = vpack.c.bf16 %v301_v16, %v297_v5 }
 0x11f   :  { %v324_v30 = vpack.c.bf16 %v300_v21, %v296_v18  ;;  %v326_v31 = vpack.c.bf16 %v302_v22, %v298_v10  ;;  %v195_v32 = vpop.f32.mrb[8].mxu0  ;;  %v268_v33 = vpop.f32.mrb[8].mxu1  ;;  %1368 = vmatpush3.bf16.msra.mxu0 %v1584_v13 }
 0x120   :  { %v196_v35 = vadd.f32 %v195_v32, %v1830_v25  ;;  %v269_v36 = vadd.f32 %v268_v33, %v1832_v26  ;;  %v197_v37 = vpop.f32.mrb[9].mxu0  ;;  %v270_v38 = vpop.f32.mrb[9].mxu1  ;;  %1369 = vmatprep.subr.bf16.mxu0 %v1585_v17 }
 0x121   :  { %v198_v40 = vadd.f32 %v197_v37, %v1836_v27  ;;  %v271_v41 = vadd.f32 %v270_v38, %v1838_v28  ;;  %v199_v42 = vpop.f32.mrb[10].mxu0  ;;  %v272_v43 = vpop.f32.mrb[10].mxu1  ;;  %773 = vmatprep.mubr.bf16.mxu1 %v324_v30  ;;  %846 = vmatprep.mubr.bf16.mxu0 %v326_v31  ;;  %v1596_v37 = vld [vmem:[%s2000_s5 + $0x38] sm:$0xff]   ;;  %v1597_v38 = vld [vmem:[%s2002_s7] sm:$0xff]  }
 0x122   :  { %v305_v44 = vmax.f32 %v269_v36, 0.0  ;;  %v200_v45 = vadd.f32 %v199_v42, %v1830_v25  ;;  %v273_v46 = vadd.f32 %v272_v43, %v1832_v26  ;;  %v201_v47 = vpop.f32.mrb[11].mxu0  ;;  %v274_v48 = vpop.f32.mrb[11].mxu1  ;;  %774 = vmatmul.mubr.bf16.gmra.mrb[20].mxu1 %v323_v24  ;;  %847 = vmatmul.mubr.bf16.gmra.mrb[20].mxu0 %v325_v29  ;;  %v303_v53 = vmax.f32 %v196_v35, 0.0  ;;  %v1594_v35 = vld [vmem:[%s2000_s5 + $0x30] sm:$0xff]   ;;  %v1595_v36 = vld [vmem:[%s2000_s5 + $0x78] sm:$0xff]  }
 0x123   :  { %v306_v49 = vmax.f32 %v271_v41, 0.0  ;;  %v202_v50 = vadd.f32 %v201_v47, %v1836_v27  ;;  %v275_v51 = vadd.f32 %v274_v48, %v1838_v28  ;;  %1370 = vmatpush3.bf16.msra.mxu0 %v1586_v34  ;;  %v304_v57 = vmax.f32 %v198_v40, 0.0  ;;  %v1593_v34 = vld [vmem:[%s2000_s5 + $0x70] sm:$0xff]   ;;  %1417 = vmatprep.subr.bf16.mxu1 %v1597_v38  ;;  %v399_v41 = vld [vmem:[%s1999_s4] sm:$0x3] }
 0x124   :  { %v307_v54 = vmax.f32 %v200_v45, 0.0  ;;  %v309_v55 = vmax.f32 %v273_v46, 0.0  ;;  %1371 = vmatprep.subr.bf16.mxu0 %v1587_v39  ;;  %v1598_v39 = vld [vmem:[%s2002_s7 + $0x8] sm:$0xff]   ;;  %1418 = vmatpush3.bf16.msra.mxu1 %v1597_v38  ;;  %v1599_v40 = vld [vmem:[%s2002_s7 + $0x10] sm:$0xff]   ;;  %v1931_v42 = vrot.slane %v399_v41, %v90_v20  ;;  %v1935_v43 = vrot.slane %v399_v41, %v94_v23 }
 0x125   :  { %v308_v58 = vmax.f32 %v202_v50, 0.0  ;;  %v310_v59 = vmax.f32 %v275_v51, 0.0  ;;  %1419 = vmatprep.subr.bf16.mxu1 %v1598_v39 }
 0x126   :  { %v327_v60 = vpack.c.bf16 %v307_v54, %v303_v53  ;;  %v329_v61 = vpack.c.bf16 %v309_v55, %v305_v44 }
 0x127   :  { %v328_v62 = vpack.c.bf16 %v308_v58, %v304_v57  ;;  %v330_v63 = vpack.c.bf16 %v310_v59, %v306_v49  ;;  %v205_v0 = vpop.f32.mrb[12].mxu0  ;;  %v278_v1 = vpop.f32.mrb[12].mxu1  ;;  %1372 = vmatpush3.bf16.msra.mxu0 %v1588_v52 }
 0x128   :  { %v206_v3 = vadd.f32 %v205_v0, %v1830_v25  ;;  %v279_v4 = vadd.f32 %v278_v1, %v1832_v26  ;;  %v207_v5 = vpop.f32.mrb[13].mxu0  ;;  %v280_v6 = vpop.f32.mrb[13].mxu1  ;;  %1373 = vmatprep.subr.bf16.mxu0 %v1589_v56  ;;  %1420 = vmatpush3.bf16.msra.mxu1 %v1598_v39 }
 0x129   :  { %v208_v7 = vadd.f32 %v207_v5, %v1836_v27  ;;  %v281_v8 = vadd.f32 %v280_v6, %v1838_v28  ;;  %v209_v9 = vpop.f32.mrb[14].mxu0  ;;  %v282_v10 = vpop.f32.mrb[14].mxu1  ;;  %783 = vmatprep.mubr.bf16.mxu1 %v328_v62  ;;  %856 = vmatprep.mubr.bf16.mxu0 %v330_v63 }
 0x12a   :  { %v313_v11 = vmax.f32 %v279_v4, 0.0  ;;  %v210_v12 = vadd.f32 %v209_v9, %v1830_v25  ;;  %v283_v13 = vadd.f32 %v282_v10, %v1832_v26  ;;  %v211_v14 = vpop.f32.mrb[15].mxu0  ;;  %v284_v15 = vpop.f32.mrb[15].mxu1  ;;  %784 = vmatmul.mubr.bf16.gmra.mrb[24].mxu1 %v327_v60  ;;  %857 = vmatmul.mubr.bf16.gmra.mrb[24].mxu0 %v329_v61  ;;  %v311_v21 = vmax.f32 %v206_v3, 0.0 }
 0x12b   :  { %v314_v16 = vmax.f32 %v281_v8, 0.0  ;;  %v212_v17 = vadd.f32 %v211_v14, %v1836_v27  ;;  %v285_v18 = vadd.f32 %v284_v15, %v1838_v28  ;;  %1374 = vmatpush3.bf16.msra.mxu0 %v1590_v2  ;;  %v312_v29 = vmax.f32 %v208_v7, 0.0  ;;  %v1591_v27 = vld [vmem:[%s2000_s5 + $0x68] sm:$0xff]   ;;  %1421 = vmatprep.subr.bf16.mxu1 %v1599_v40 }
 0x12c   :  { %v315_v22 = vmax.f32 %v210_v12, 0.0  ;;  %v317_v24 = vmax.f32 %v283_v13, 0.0  ;;  %v1592_v28 = vld [vmem:[%s2000_s5 + $0x28] sm:$0xff]   ;;  %1375 = vmatprep.subr.bf16.mxu0 %v1591_v27  ;;  %1422 = vmatpush3.bf16.msra.mxu1 %v1599_v40 }
 0x12d   :  { %v316_v30 = vmax.f32 %v212_v17, 0.0  ;;  %v318_v31 = vmax.f32 %v285_v18, 0.0 }
 0x12e   :  { %v331_v32 = vpack.c.bf16 %v315_v22, %v311_v21  ;;  %v333_v25 = vpack.c.bf16 %v317_v24, %v313_v11 }
 0x12f   :  { %v332_v33 = vpack.c.bf16 %v316_v30, %v312_v29  ;;  %v334_v26 = vpack.c.bf16 %v318_v31, %v314_v16  ;;  %1376 = vmatpush3.bf16.msra.mxu0 %v1592_v28 }
 0x130   :  { %1377 = vmatprep.subr.bf16.mxu0 %v1593_v34 }
 0x131   :  { %793 = vmatprep.mubr.bf16.mxu1 %v332_v33  ;;  %866 = vmatprep.mubr.bf16.mxu0 %v334_v26 }
 0x132   :  { %794 = vmatmul.mubr.bf16.gmra.mrb[28].mxu1 %v331_v32  ;;  %867 = vmatmul.mubr.bf16.gmra.mrb[28].mxu0 %v333_v25 }
 0x133   :  { %1378 = vmatpush3.bf16.msra.mxu0 %v1594_v35 }
 0x134   :  { %1379 = vmatprep.subr.bf16.mxu0 %v1595_v36 }
 0x137   :  { %1380 = vmatpush3.bf16.msra.mxu0 %v1596_v37 }
 0x1ed   :  { %v765_v44 = vpop.f32.mrb[16].mxu1  ;;  %v838_v45 = vpop.f32.mrb[16].mxu0 }
 0x1ee   :  { %v766_v46 = vadd.f32 %v765_v44, %v1931_v42  ;;  %v767_v47 = vpop.f32.mrb[17].mxu1  ;;  %v840_v48 = vpop.f32.mrb[17].mxu0 }
 0x1ef   :  { %v768_v49 = vadd.f32 %v767_v47, %v1935_v43  ;;  %v769_v50 = vpop.f32.mrb[18].mxu1  ;;  %v842_v51 = vpop.f32.mrb[18].mxu0 }
 0x1f0   :  { %v839_v52 = vadd.f32 %v838_v45, %v766_v46  ;;  %v770_v53 = vadd.f32 %v769_v50, %v1931_v42  ;;  %v771_v54 = vpop.f32.mrb[19].mxu1  ;;  %v844_v20 = vpop.f32.mrb[19].mxu0 }
 0x1f1   :  { %v841_v55 = vadd.f32 %v840_v48, %v768_v49  ;;  %v772_v19 = vadd.f32 %v771_v54, %v1935_v43 }
 0x1f2   :  { %v843_v23 = vadd.f32 %v842_v51, %v770_v53  ;;  %v877_v57 = vmax.f32 %v839_v52, 0.0 }
 0x1f3   :  { %v845_v56 = vadd.f32 %v844_v20, %v772_v19  ;;  %v878_v59 = vmax.f32 %v841_v55, 0.0 }
 0x1f4   :  { %v879_v58 = vmax.f32 %v843_v23, 0.0 }
 0x1f5   :  { %v880_v60 = vmax.f32 %v845_v56, 0.0  ;;  %v775_v61 = vpop.f32.mrb[20].mxu1  ;;  %v848_v62 = vpop.f32.mrb[20].mxu0 }
 0x1f6   :  { %v893_v63 = vpack.c.bf16 %v879_v58, %v877_v57  ;;  %v776_v0 = vadd.f32 %v775_v61, %v1931_v42  ;;  %v777_v1 = vpop.f32.mrb[21].mxu1  ;;  %v850_v2 = vpop.f32.mrb[21].mxu0 }
 0x1f7   :  { %v894_v3 = vpack.c.bf16 %v880_v60, %v878_v59  ;;  %v778_v4 = vadd.f32 %v777_v1, %v1935_v43  ;;  %v779_v5 = vpop.f32.mrb[22].mxu1  ;;  %v852_v6 = vpop.f32.mrb[22].mxu0 }
 0x1f8   :  { %v849_v7 = vadd.f32 %v848_v62, %v776_v0  ;;  %v780_v8 = vadd.f32 %v779_v5, %v1931_v42  ;;  %v781_v9 = vpop.f32.mrb[23].mxu1  ;;  %v854_v10 = vpop.f32.mrb[23].mxu0  ;;  %v1604_v5 = vld [vmem:[%s2002_s7 + $0x38] sm:$0xff]  }
 0x1f9   :  { %v851_v11 = vadd.f32 %v850_v2, %v778_v4  ;;  %v782_v12 = vadd.f32 %v781_v9, %v1935_v43  ;;  %1068 = vmatprep.mubr.bf16.mxu0 %v894_v3  ;;  %v1602_v3 = vld [vmem:[%s2002_s7 + $0x28] sm:$0xff]   ;;  %v1603_v4 = vld [vmem:[%s2002_s7 + $0x30] sm:$0xff]  }
 0x1fa   :  { %v853_v13 = vadd.f32 %v852_v6, %v780_v8  ;;  %1069 = vmatmul.mubr.bf16.vlgmr.msra.gmra.mrb[32].mxu0 %v893_v63  ;;  %v881_v15 = vmax.f32 %v849_v7, 0.0  ;;  %v1339_v7 = vld [vmem:[%s2001_s6] ss:$0 sm:$0xff] }
 0x1fb   :  { %v855_v14 = vadd.f32 %v854_v10, %v782_v12  ;;  %v882_v17 = vmax.f32 %v851_v11, 0.0 }
 0x1fc   :  { %v883_v16 = vmax.f32 %v853_v13, 0.0 }
 0x1fd   :  { %v884_v18 = vmax.f32 %v855_v14, 0.0  ;;  %v785_v21 = vpop.f32.mrb[24].mxu1  ;;  %v858_v22 = vpop.f32.mrb[24].mxu0 }
 0x1fe   :  { %v895_v24 = vpack.c.bf16 %v883_v16, %v881_v15  ;;  %v786_v29 = vadd.f32 %v785_v21, %v1931_v42  ;;  %v787_v30 = vpop.f32.mrb[25].mxu1  ;;  %v860_v31 = vpop.f32.mrb[25].mxu0 }
 0x1ff   :  { %v896_v32 = vpack.c.bf16 %v884_v18, %v882_v17  ;;  %v788_v25 = vadd.f32 %v787_v30, %v1935_v43  ;;  %v789_v33 = vpop.f32.mrb[26].mxu1  ;;  %v862_v26 = vpop.f32.mrb[26].mxu0 }
 0x200   :  { %v859_v27 = vadd.f32 %v858_v22, %v786_v29  ;;  %v790_v28 = vadd.f32 %v789_v33, %v1931_v42  ;;  %v791_v34 = vpop.f32.mrb[27].mxu1  ;;  %v864_v35 = vpop.f32.mrb[27].mxu0 }
 0x201   :  { %v861_v36 = vadd.f32 %v860_v31, %v788_v25  ;;  %v792_v37 = vadd.f32 %v791_v34, %v1935_v43  ;;  %1076 = vmatprep.mubr.bf16.mxu0 %v896_v32 }
 0x202   :  { %v863_v38 = vadd.f32 %v862_v26, %v790_v28  ;;  %1077 = vmatmul.mubr.bf16.gmra.mrb[36].mxu0 %v895_v24  ;;  %v885_v40 = vmax.f32 %v859_v27, 0.0 }
 0x203   :  { %v865_v39 = vadd.f32 %v864_v35, %v792_v37  ;;  %v886_v44 = vmax.f32 %v861_v36, 0.0 }
 0x204   :  { %v887_v41 = vmax.f32 %v863_v38, 0.0 }
 0x205   :  { %v888_v45 = vmax.f32 %v865_v39, 0.0  ;;  %v795_v46 = vpop.f32.mrb[28].mxu1  ;;  %v868_v47 = vpop.f32.mrb[28].mxu0 }
 0x206   :  { %v897_v48 = vpack.c.bf16 %v887_v41, %v885_v40  ;;  %v796_v49 = vadd.f32 %v795_v46, %v1931_v42  ;;  %v797_v50 = vpop.f32.mrb[29].mxu1  ;;  %v870_v51 = vpop.f32.mrb[29].mxu0 }
 0x207   :  { %v898_v52 = vpack.c.bf16 %v888_v45, %v886_v44  ;;  %v798_v53 = vadd.f32 %v797_v50, %v1935_v43  ;;  %v799_v54 = vpop.f32.mrb[30].mxu1  ;;  %v872_v20 = vpop.f32.mrb[30].mxu0 }
 0x208   :  { %v869_v55 = vadd.f32 %v868_v47, %v796_v49  ;;  %v800_v19 = vadd.f32 %v799_v54, %v1931_v42  ;;  %v801_v23 = vpop.f32.mrb[31].mxu1  ;;  %v874_v56 = vpop.f32.mrb[31].mxu0  ;;  %v1600_v42 = vld [vmem:[%s2002_s7 + $0x18] sm:$0xff]  }
 0x209   :  { %v871_v57 = vadd.f32 %v870_v51, %v798_v53  ;;  %v802_v58 = vadd.f32 %v801_v23, %v1935_v43  ;;  %1084 = vmatprep.mubr.bf16.mxu0 %v898_v52  ;;  %1423 = vmatprep.subr.bf16.mxu1 %v1600_v42  ;;  %v1601_v43 = vld [vmem:[%s2002_s7 + $0x20] sm:$0xff]  }
 0x20a   :  { %v873_v59 = vadd.f32 %v872_v20, %v800_v19  ;;  %1085 = vmatmul.mubr.bf16.gmra.mrb[40].mxu0 %v897_v48  ;;  %v889_v61 = vmax.f32 %v869_v55, 0.0  ;;  %1424 = vmatpush3.bf16.msra.mxu1 %v1600_v42  ;;  %v1356_v55 = vld [vmem:[#allocation6] ss:$0 sm:$0xff] }
 0x20b   :  { %v875_v60 = vadd.f32 %v874_v56, %v802_v58  ;;  %v890_v63 = vmax.f32 %v871_v57, 0.0  ;;  %1425 = vmatprep.subr.bf16.mxu1 %v1601_v43 }
 0x20c   :  { %v891_v62 = vmax.f32 %v873_v59, 0.0 }
 0x20d   :  { %v892_v0 = vmax.f32 %v875_v60, 0.0 }
 0x20e   :  { %v899_v1 = vpack.c.bf16 %v891_v62, %v889_v61  ;;  %1426 = vmatpush3.bf16.msra.mxu1 %v1601_v43 }
 0x20f   :  { %v900_v2 = vpack.c.bf16 %v892_v0, %v890_v63  ;;  %1427 = vmatprep.subr.bf16.mxu1 %v1602_v3 }
 0x211   :  { %1092 = vmatprep.mubr.bf16.mxu0 %v900_v2 }
 0x212   :  { %1093 = vmatmul.mubr.bf16.gmra.mrb[44].mxu0 %v899_v1  ;;  %1428 = vmatpush3.bf16.msra.mxu1 %v1602_v3 }
 0x213   :  { %1429 = vmatprep.subr.bf16.mxu1 %v1603_v4 }
 0x216   :  { %1430 = vmatpush3.bf16.msra.mxu1 %v1603_v4 }
 0x217   :  { %1431 = vmatprep.subr.bf16.mxu1 %v1604_v5 }
 0x21a   :  { %1432 = vmatpush3.bf16.msra.mxu1 %v1604_v5 }
 0x2cd   :  { %v1381_v6 = vpop.f32.mrb[32].mxu0 }
 0x2ce   :  { %v1382_v8 = vpop.f32.mrb[33].mxu0 }
 0x2cf   :  { %v1383_v9 = vadd.f32 %v1382_v8, %v1381_v6  ;;  %v1384_v10 = vpop.f32.mrb[34].mxu0 }
 0x2d0   :  { %v1385_v11 = vpop.f32.mrb[35].mxu0 }
 0x2d1   :  { %v1071_v12 = vadd.f32 %v1383_v9, %v1339_v7  ;;  %v1386_v13 = vadd.f32 %v1385_v11, %v1384_v10 }
 0x2d3   :  { %v1074_v14 = vadd.f32 %v1386_v13, %v1339_v7  ;;  %v1101_v15 = vmax.f32 %v1071_v12, 0.0 }
 0x2d5   :  { %v1102_v16 = vmax.f32 %v1074_v14, 0.0  ;;  %v1387_v17 = vpop.f32.mrb[36].mxu0 }
 0x2d6   :  { %v1388_v18 = vpop.f32.mrb[37].mxu0 }
 0x2d7   :  { %v1389_v21 = vadd.f32 %v1388_v18, %v1387_v17  ;;  %v1390_v22 = vpop.f32.mrb[38].mxu0  ;;  %v1109_v24 = vpack.c.bf16 %v1102_v16, %v1101_v15 }
 0x2d8   :  { %v1391_v29 = vpop.f32.mrb[39].mxu0 }
 0x2d9   :  { %v1079_v30 = vadd.f32 %v1389_v21, %v1339_v7  ;;  %v1392_v31 = vadd.f32 %v1391_v29, %v1390_v22  ;;  %1433 = vmatprep.mubr.bf16.mxu1 %v1109_v24 }
 0x2db   :  { %v1082_v32 = vadd.f32 %v1392_v31, %v1339_v7  ;;  %v1103_v25 = vmax.f32 %v1079_v30, 0.0 }
 0x2dd   :  { %v1104_v33 = vmax.f32 %v1082_v32, 0.0  ;;  %v1393_v26 = vpop.f32.mrb[40].mxu0 }
 0x2de   :  { %v1394_v27 = vpop.f32.mrb[41].mxu0 }
 0x2df   :  { %v1110_v28 = vpack.c.bf16 %v1104_v33, %v1103_v25  ;;  %v1395_v34 = vadd.f32 %v1394_v27, %v1393_v26  ;;  %v1396_v35 = vpop.f32.mrb[42].mxu0 }
 0x2e0   :  { %v1397_v36 = vpop.f32.mrb[43].mxu0 }
 0x2e1   :  { %v1087_v37 = vadd.f32 %v1395_v34, %v1339_v7  ;;  %v1398_v38 = vadd.f32 %v1397_v36, %v1396_v35  ;;  %1434 = vmatmul.mubr.bf16.vlgmr.msra.gmra.mrb[32].mxu1 %v1110_v28 }
 0x2e3   :  { %v1090_v39 = vadd.f32 %v1398_v38, %v1339_v7  ;;  %v1105_v40 = vmax.f32 %v1087_v37, 0.0 }
 0x2e5   :  { %v1106_v41 = vmax.f32 %v1090_v39, 0.0  ;;  %v1399_v44 = vpop.f32.mrb[44].mxu0 }
 0x2e6   :  { %v1400_v45 = vpop.f32.mrb[45].mxu0 }
 0x2e7   :  { %v1401_v46 = vadd.f32 %v1400_v45, %v1399_v44  ;;  %v1402_v47 = vpop.f32.mrb[46].mxu0  ;;  %v1111_v48 = vpack.c.bf16 %v1106_v41, %v1105_v40 }
 0x2e8   :  { %v1403_v49 = vpop.f32.mrb[47].mxu0 }
 0x2e9   :  { %v1095_v50 = vadd.f32 %v1401_v46, %v1339_v7  ;;  %v1404_v51 = vadd.f32 %v1403_v49, %v1402_v47  ;;  %1437 = vmatprep.mubr.bf16.mxu1 %v1111_v48 }
 0x2eb   :  { %v1098_v52 = vadd.f32 %v1404_v51, %v1339_v7  ;;  %v1107_v53 = vmax.f32 %v1095_v50, 0.0 }
 0x2ed   :  { %v1108_v54 = vmax.f32 %v1098_v52, 0.0 }
 0x2ef   :  { %v1112_v20 = vpack.c.bf16 %v1108_v54, %v1107_v53 }
 0x2f1   :  { %1438 = vmatmul.mubr.bf16.gmra.mrb[36].mxu1 %v1112_v20 }
 0x3b4   :  { %v1435_v19 = vpop.f32.mrb[32].mxu1 }
 0x3b5   :  { %v1227_v23 = vadd.f32 %v1435_v19, %v1356_v55  ;;  %v1218_v56 = vpop.f32.mrb[33].mxu1 }
 0x3b6   :  { %v1219_v57 = vadd.f32 %v1356_v55, %v1218_v56  ;;  %v1436_v58 = vpop.f32.mrb[34].mxu1 }
 0x3b7   :  { %1251 = vst [vmem:[%s2004_s9 + $0x10] sm:$0xff] %v1227_v23  ;;  %v1230_v59 = vadd.f32 %v1436_v58, %v1356_v55  ;;  %v1221_v60 = vpop.f32.mrb[35].mxu1 }
 0x3b8   :  { %1249 = vst [vmem:[%s2004_s9] sm:$0xff] %v1219_v57  ;;  %v1222_v61 = vadd.f32 %v1356_v55, %v1221_v60 }
 0x3b9   :  { %1252 = vst [vmem:[%s2004_s9 + $0x18] sm:$0xff] %v1230_v59 }
 0x3ba   :  { %1250 = vst [vmem:[%s2004_s9 + $0x8] sm:$0xff] %v1222_v61 }
 0x3c4   :  { %v1439_v62 = vpop.f32.mrb[36].mxu1 }
 0x3c5   :  { %v1243_v63 = vadd.f32 %v1439_v62, %v1356_v55  ;;  %v1234_v0 = vpop.f32.mrb[37].mxu1 }
 0x3c6   :  { %v1235_v1 = vadd.f32 %v1356_v55, %v1234_v0  ;;  %v1440_v2 = vpop.f32.mrb[38].mxu1 }
 0x3c7   :  { %1255 = vst [vmem:[%s2004_s9 + $0x30] sm:$0xff] %v1243_v63  ;;  %v1246_v42 = vadd.f32 %v1440_v2, %v1356_v55  ;;  %v1237_v43 = vpop.f32.mrb[39].mxu1 }
 0x3c8   :  { %1253 = vst [vmem:[%s2004_s9 + $0x20] sm:$0xff] %v1235_v1  ;;  %v1238_v3 = vadd.f32 %v1356_v55, %v1237_v43 }
 0x3c9   :  { %1256 = vst [vmem:[%s2004_s9 + $0x38] sm:$0xff] %v1246_v42 }
 0x3ca   :  { %1254 = vst [vmem:[%s2004_s9 + $0x28] sm:$0xff] %v1238_v3 }
 0x3cb   :  { %1261 = vsyncpa [#allocation3], 1 }
 0x3cc   :  { %1262 = vsyncpa [#allocation5], 1 }

</bundles_post_ra>
